<compile_context>
chip_gen: v7x
topology: tpu7x:2x2x1
jax: 0.10.0
libtpu: 0.0.40
codegen_flags: <defaults>
</compile_context>

<pallas_src>
import functools

import jax
import jax.numpy as jnp
from jax import lax
from jax.experimental import pallas as pl
from jax.experimental.pallas import tpu as pltpu


def _lora_kernel_f32out(x_ref, w_ref, b_ref, at_ref, t_ref, o_ref):
    """f32 output: accumulate the K reduction directly into o_ref."""
    k = pl.program_id(2)
    nk = pl.num_programs(2)

    @pl.when(k == 0)
    def _init():
        o_ref[...] = jnp.zeros_like(o_ref)

    # Base path: x @ W.T — contract K (dim 1 of both operands), f32 accum.
    o_ref[...] += lax.dot_general(
        x_ref[...], w_ref[...],                         # (tm, tk) x (tn, tk)
        dimension_numbers=(((1,), (1,)), ((), ())),
        preferred_element_type=jnp.float32)

    @pl.when(k == nk - 1)
    def _finalize():
        # Rank-r up-projection exactly once per output tile: t @ lora_A.T,
        # with lora_A pre-transposed to (r, N) → lane-dense (r, tn) tile.
        up = lax.dot_general(
            t_ref[...], at_ref[...],                    # (tm, r) x (r, tn)
            dimension_numbers=(((1,), (0,)), ((), ())),
            preferred_element_type=jnp.float32)
        o_ref[...] += up + b_ref[...]


def _lora_kernel_scratch(x_ref, w_ref, b_ref, at_ref, t_ref, o_ref, acc_ref):
    """Narrow-output fallback: f32 VMEM accumulator + cast in the epilogue."""
    k = pl.program_id(2)
    nk = pl.num_programs(2)

    @pl.when(k == 0)
    def _init():
        acc_ref[...] = jnp.zeros_like(acc_ref)

    acc_ref[...] += lax.dot_general(
        x_ref[...], w_ref[...],
        dimension_numbers=(((1,), (1,)), ((), ())),
        preferred_element_type=jnp.float32)

    @pl.when(k == nk - 1)
    def _finalize():
        up = lax.dot_general(
            t_ref[...], at_ref[...],
            dimension_numbers=(((1,), (0,)), ((), ())),
            preferred_element_type=jnp.float32)
        o_ref[...] = (acc_ref[...] + up + b_ref[...]).astype(o_ref.dtype)


def _ceil_to(x, m):
    return ((x + m - 1) // m) * m


def _pad_2d(a, rows, cols):
    pr, pc = rows - a.shape[0], cols - a.shape[1]
    if pr or pc:
        a = jnp.pad(a, ((0, pr), (0, pc)))
    return a


@functools.partial(jax.jit, static_argnames=("tm", "tn", "tk", "compute_dtype"))
def lora_linear(x, W, b, lora_A, lora_B, *, tm=512, tn=1024, tk=1024,
                compute_dtype=jnp.bfloat16):
    """LoRA-augmented linear: x @ W.T + b + (x @ lora_B.T) @ lora_A.T.

    x: (M, K); W: (N, K); b: (N,); lora_A: (N, r); lora_B: (r, K).
    MXU runs in `compute_dtype` (bf16 by default) with f32 accumulation; the
    output keeps x's dtype (f32 accumulates directly in the output tile).
    """
    M, K = x.shape
    N = W.shape[0]
    r = lora_A.shape[1]
    out_dtype = x.dtype

    # Dtype-aware sublane alignment (bf16 packs 16 rows/vreg, f32 packs 8).
    sub = 16 if jnp.dtype(compute_dtype).itemsize == 2 else 8

    # Clamp tile sizes to the (aligned) problem dims.
    tm = min(tm, _ceil_to(M, sub))
    tn = min(tn, _ceil_to(N, 128))
    tk = min(tk, _ceil_to(K, 128))

    Mp, Np, Kp = _ceil_to(M, tm), _ceil_to(N, tn), _ceil_to(K, tk)

    # Zero-pad to tile multiples and cast the MXU operands to compute_dtype.
    # Weight layouts stay PyTorch-native except lora_A, transposed once to
    # (r, N) so the kernel's up-projection operand is lane-dense.
    xp = _pad_2d(x, Mp, Kp).astype(compute_dtype)
    Wp = _pad_2d(W, Np, Kp).astype(compute_dtype)
    Bp = _pad_2d(lora_B, r, Kp).astype(compute_dtype)
    Atp = _pad_2d(lora_A.T, r, Np).astype(compute_dtype)
    bp = _pad_2d(b.reshape(1, N), 1, Np).astype(jnp.float32)

    # LoRA down-projection hoisted out of the kernel: tiny (Mp, r) matmul.
    tp = lax.dot_general(
        xp, Bp, dimension_numbers=(((1,), (1,)), ((), ())),
        preferred_element_type=jnp.float32).astype(compute_dtype)

    grid = (Mp // tm, Np // tn, Kp // tk)

    in_specs = [
        pl.BlockSpec((tm, tk), lambda i, j, k: (i, k)),   # x
        pl.BlockSpec((tn, tk), lambda i, j, k: (j, k)),   # W (N, K)
        pl.BlockSpec((1, tn), lambda i, j, k: (0, j)),    # bias (f32)
        pl.BlockSpec((r, tn), lambda i, j, k: (0, j)),    # lora_A.T (r, N)
        pl.BlockSpec((tm, r), lambda i, j, k: (i, 0)),    # t = x @ lora_B.T
    ]
    out_spec = pl.BlockSpec((tm, tn), lambda i, j, k: (i, j))

    cost = pl.CostEstimate(
        flops=2 * M * N * K + 2 * M * K * r + 2 * M * r * N,
        transcendentals=0,
        bytes_accessed=(x.size + W.size + b.size + lora_A.size + lora_B.size
                        + M * N) * jnp.dtype(out_dtype).itemsize,
    )

    if out_dtype == jnp.float32:
        kernel = _lora_kernel_f32out
        scratch_shapes = []
    else:
        kernel = _lora_kernel_scratch
        scratch_shapes = [pltpu.VMEM((tm, tn), jnp.float32)]

    out = pl.pallas_call(
        kernel,
        out_shape=jax.ShapeDtypeStruct((Mp, Np), out_dtype),
        grid_spec=pltpu.PrefetchScalarGridSpec(
            num_scalar_prefetch=0,
            grid=grid,
            in_specs=in_specs,
            out_specs=out_spec,
            scratch_shapes=scratch_shapes,
        ),
        compiler_params=pltpu.CompilerParams(
            dimension_semantics=("parallel", "parallel", "arbitrary"),
            vmem_limit_bytes=64 * 1024 * 1024),
        cost_estimate=cost,
    )(xp, Wp, bp, Atp, tp)

    return out[:M, :N]


if __name__ == "__main__":
    key = jax.random.PRNGKey(0)
    kx, kw, kb, ka, klb = jax.random.split(key, 5)

    # Small shapes consistent with the module: batch=8, in=32, out=32, r=8.
    M, K, N, r = 8, 32, 32, 8
    x = jax.random.normal(kx, (M, K), dtype=jnp.float32)
    W = jax.random.normal(kw, (N, K), dtype=jnp.float32) * (1.0 / jnp.sqrt(K))
    b = jax.random.normal(kb, (N,), dtype=jnp.float32) * (1.0 / jnp.sqrt(K))
    lora_A = jax.random.normal(ka, (N, r), dtype=jnp.float32) * 0.01   # randn*0.01
    lora_B = jax.random.normal(klb, (r, K), dtype=jnp.float32) * 0.01

    out = jax.block_until_ready(lora_linear(x, W, b, lora_A, lora_B))
    ref = x @ W.T + b + (x @ lora_B.T) @ lora_A.T
    # bf16 MXU datapath → relaxed tolerance vs. the f32 reference.
    assert jnp.allclose(out, ref, atol=5e-2, rtol=5e-2), "small-shape mismatch"

    # Multi-tile sanity check (exercises K reduction, epilogue, and j-tiling).
    M2, K2, N2, r2 = 512, 2048, 2048, 8
    x2 = jax.random.normal(kx, (M2, K2), dtype=jnp.float32)
    W2 = jax.random.normal(kw, (N2, K2), dtype=jnp.float32) * (1.0 / jnp.sqrt(K2))
    b2 = jax.random.normal(kb, (N2,), dtype=jnp.float32) * (1.0 / jnp.sqrt(K2))
    A2 = jax.random.normal(ka, (N2, r2), dtype=jnp.float32) * 0.01
    B2 = jax.random.normal(klb, (r2, K2), dtype=jnp.float32) * 0.01

    out2 = jax.block_until_ready(lora_linear(x2, W2, b2, A2, B2))
    x2b, W2b, A2b, B2b = (v.astype(jnp.bfloat16) for v in (x2, W2, A2, B2))
    ref2 = (jnp.einsum("mk,nk->mn", x2b, W2b,
                       preferred_element_type=jnp.float32)
            + b2
            + jnp.einsum("mr,nr->mn",
                         jnp.einsum("mk,rk->mr", x2b, B2b,
                                    preferred_element_type=jnp.float32
                                    ).astype(jnp.bfloat16),
                         A2b, preferred_element_type=jnp.float32))
    assert jnp.allclose(out2, ref2, atol=5e-2, rtol=5e-2), "multi-tile mismatch"

    print("KERNEL_OK")
</pallas_src>

<mosaic_0001>
module attributes {stable_mosaic.version = 11 : i64} {
  func.func @_lora_kernel_f32out(%arg0: i32, %arg1: i32, %arg2: i32, %arg3: memref<16x128xbf16, #tpu.memory_space<vmem>>, %arg4: memref<128x128xbf16, #tpu.memory_space<vmem>>, %arg5: memref<1x128xf32, #tpu.memory_space<vmem>>, %arg6: memref<8x128xbf16, #tpu.memory_space<vmem>>, %arg7: memref<16x8xbf16, #tpu.memory_space<vmem>>, %arg8: memref<16x128xf32, #tpu.memory_space<vmem>>) attributes {dimension_semantics = [#tpu.dimension_semantics<parallel>, #tpu.dimension_semantics<parallel>, #tpu.dimension_semantics<arbitrary>], iteration_bounds = array<i64: 1, 1, 1>, scalar_prefetch = 0 : i64, scratch_operands = 0 : i64, tpu.core_type = #tpu.core_type<tc>, window_params = [{transform_indices = @transform_0, window_bounds = array<i64: 16, 128>}, {transform_indices = @transform_1, window_bounds = array<i64: 128, 128>}, {transform_indices = @transform_2, window_bounds = array<i64: 1, 128>}, {transform_indices = @transform_3, window_bounds = array<i64: 8, 128>}, {transform_indices = @transform_4, window_bounds = array<i64: 16, 8>}, {transform_indices = @transform_5, window_bounds = array<i64: 16, 128>}]} {
    %c0_i32 = arith.constant 0 : i32
    %0 = arith.cmpi eq, %arg2, %c0_i32 : i32
    %1 = arith.extui %0 : i1 to i32
    %c0_i32_0 = arith.constant 0 : i32
    %2 = arith.cmpi ne, %1, %c0_i32_0 : i32
    scf.if %2 {
      %cst_10 = arith.constant 0.000000e+00 : f32
      %12 = vector.broadcast %cst_10 : f32 to vector<16x128xf32>
      %c0_11 = arith.constant 0 : index
      %c0_12 = arith.constant 0 : index
      %13 = vector.load %arg8[%c0_11, %c0_12] : memref<16x128xf32, #tpu.memory_space<vmem>>, vector<16x128xf32>
      tpu.vector_store %arg8[%c0_11, %c0_12], %12 {strides = array<i32>} : memref<16x128xf32, #tpu.memory_space<vmem>>, vector<16x128xf32>,
    } else {
    }
    %c0 = arith.constant 0 : index
    %c0_1 = arith.constant 0 : index
    %3 = vector.load %arg8[%c0, %c0_1] : memref<16x128xf32, #tpu.memory_space<vmem>>, vector<16x128xf32>
    %c0_2 = arith.constant 0 : index
    %c0_3 = arith.constant 0 : index
    %4 = vector.load %arg3[%c0_2, %c0_3] : memref<16x128xbf16, #tpu.memory_space<vmem>>, vector<16x128xbf16>
    %c0_4 = arith.constant 0 : index
    %c0_5 = arith.constant 0 : index
    %5 = vector.load %arg4[%c0_4, %c0_5] : memref<128x128xbf16, #tpu.memory_space<vmem>>, vector<128x128xbf16>
    %cst = arith.constant dense<0.000000e+00> : vector<16x128xf32>
    %6 = tpu.matmul %4, %5, %cst {dimension_numbers = #tpu.dot_dimension_numbers<[1], [1], [0], [0], [0, 0, 1, 0], [], []>} : vector<16x128xbf16>, vector<128x128xbf16>, vector<16x128xf32> -> vector<16x128xf32>
    %7 = arith.addf %3, %6 : vector<16x128xf32>
    %c0_6 = arith.constant 0 : index
    %c0_7 = arith.constant 0 : index
    %8 = vector.load %arg8[%c0_6, %c0_7] : memref<16x128xf32, #tpu.memory_space<vmem>>, vector<16x128xf32>
    tpu.vector_store %arg8[%c0_6, %c0_7], %7 {strides = array<i32>} : memref<16x128xf32, #tpu.memory_space<vmem>>, vector<16x128xf32>,
    %c0_i32_8 = arith.constant 0 : i32
    %9 = arith.cmpi eq, %arg2, %c0_i32_8 : i32
    %10 = arith.extui %9 : i1 to i32
    %c0_i32_9 = arith.constant 0 : i32
    %11 = arith.cmpi ne, %10, %c0_i32_9 : i32
    scf.if %11 {
      %c0_10 = arith.constant 0 : index
      %c0_11 = arith.constant 0 : index
      %12 = vector.load %arg7[%c0_10, %c0_11] : memref<16x8xbf16, #tpu.memory_space<vmem>>, vector<16x8xbf16>
      %c0_12 = arith.constant 0 : index
      %c0_13 = arith.constant 0 : index
      %13 = vector.load %arg6[%c0_12, %c0_13] : memref<8x128xbf16, #tpu.memory_space<vmem>>, vector<8x128xbf16>
      %cst_14 = arith.constant dense<0.000000e+00> : vector<16x128xf32>
      %14 = tpu.matmul %12, %13, %cst_14 {dimension_numbers = #tpu.dot_dimension_numbers<[1], [0], [0], [1], [0, 0, 1, 1], [], []>} : vector<16x8xbf16>, vector<8x128xbf16>, vector<16x128xf32> -> vector<16x128xf32>
      %c0_15 = arith.constant 0 : index
      %c0_16 = arith.constant 0 : index
      %15 = vector.load %arg8[%c0_15, %c0_16] : memref<16x128xf32, #tpu.memory_space<vmem>>, vector<16x128xf32>
      %c0_17 = arith.constant 0 : index
      %c0_18 = arith.constant 0 : index
      %16 = vector.load %arg5[%c0_17, %c0_18] : memref<1x128xf32, #tpu.memory_space<vmem>>, vector<1x128xf32>
      %17 = vector.broadcast %16 : vector<1x128xf32> to vector<16x128xf32>
      %18 = arith.addf %14, %17 : vector<16x128xf32>
      %19 = arith.addf %15, %18 : vector<16x128xf32>
      %c0_19 = arith.constant 0 : index
      %c0_20 = arith.constant 0 : index
      %20 = vector.load %arg8[%c0_19, %c0_20] : memref<16x128xf32, #tpu.memory_space<vmem>>, vector<16x128xf32>
      tpu.vector_store %arg8[%c0_19, %c0_20], %19 {strides = array<i32>} : memref<16x128xf32, #tpu.memory_space<vmem>>, vector<16x128xf32>,
    } else {
    }
    return
  }
  func.func @transform_0(%arg0: i32, %arg1: i32, %arg2: i32) -> (i32, i32) {
    %c0_i32 = arith.constant 0 : i32
    return %arg0, %arg2 : i32, i32
  }
  func.func @transform_1(%arg0: i32, %arg1: i32, %arg2: i32) -> (i32, i32) {
    %c0_i32 = arith.constant 0 : i32
    return %arg1, %arg2 : i32, i32
  }
  func.func @transform_2(%arg0: i32, %arg1: i32, %arg2: i32) -> (i32, i32) {
    %c0_i32 = arith.constant 0 : i32
    %c0_i32_0 = arith.constant 0 : i32
    return %c0_i32, %arg1 : i32, i32
  }
  func.func @transform_3(%arg0: i32, %arg1: i32, %arg2: i32) -> (i32, i32) {
    %c0_i32 = arith.constant 0 : i32
    %c0_i32_0 = arith.constant 0 : i32
    return %c0_i32, %arg1 : i32, i32
  }
  func.func @transform_4(%arg0: i32, %arg1: i32, %arg2: i32) -> (i32, i32) {
    %c0_i32 = arith.constant 0 : i32
    %c0_i32_0 = arith.constant 0 : i32
    return %arg0, %c0_i32 : i32, i32
  }
  func.func @transform_5(%arg0: i32, %arg1: i32, %arg2: i32) -> (i32, i32) {
    %c0_i32 = arith.constant 0 : i32
    return %arg0, %arg1 : i32, i32
  }
}

</mosaic_0001>

<bundles_post_ra>
// kernel: lora_linear.1
= control target key start
LH: loop header
LB: loop body
LE: loop exit
PB: predicated region body
PF: predicated region fallthrough
CT: control target
= control target key end

     0   :  { %10 = vsyncpa [#allocation3], 0  ;;  %s651_s0 = inlined_call_operand.hbm [shape: bf16[16,128], index: 0, kind: input, shape index: {}]   ;;  %s652_s1 = inlined_call_operand.hbm [shape: bf16[128,128], index: 1, kind: input, shape index: {}]   ;;  %s653_s2 = inlined_call_operand.hbm [shape: f32[1,128], index: 2, kind: input, shape index: {}]   ;;  %s654_s3 = inlined_call_operand.hbm [shape: bf16[8,128], index: 3, kind: input, shape index: {}]   ;;  %s655_s4 = inlined_call_operand.hbm [shape: bf16[16,8], index: 4, kind: input, shape index: {}]   ;;  %s656_s5 = inlined_call_operand.hbm [shape: f32[16,128], index: 5, kind: output, shape index: {}]  }
   0x1   :  { %11 = vsyncpa [#allocation6], 0 }
   0x2   :  { %12 = vsyncpa [#allocation9], 0 }
   0x3   :  { %13 = vsyncpa [#allocation4], 0  ;;  %s528_s18 = smov [#allocation5]   ;;  %s529_s20 = smov [#allocation8]  }
   0x4   :  { %s31_s19 = sshll.u32 %s528_s18, 4  ;;  %s54_s21 = sshll.u32 %s529_s20, 4  ;;  %s32_s19 = int_to_ptr.vmem [resolvable:$true] %s31_s19  ;;  %s55_s21 = int_to_ptr.vmem [resolvable:$true] %s54_s21 }
   0x5   :  { %s388_s24 = scalar_lea.hbm %s652_s1, 1024 }
   0x6   :  { %p389_p0 = scmp.ne.s32.totalorder %s652_s1, %s388_s24  ;;  %p392_p1 = scmp.lt.u32.totalorder %s388_s24, %s652_s1 }
   0x8   :  { %p394_p2 = pnand %p392_p1, %p389_p0 }
   0xa   :  { %397 = shalt.err (!%p394_p2)
}
   0xb   :  { %s398_s29 = scalar_lea.vmem %s32_s19, 1024  ;;  %p403_p4 = scmp.lt.s32.totalorder %s32_s19, %s32_s19 }
   0xc   :  { %p399_p3 = scmp.ne.s32.totalorder %s32_s19, %s398_s29  ;;  %p404_p5 = scmp.lt.s32.totalorder %s398_s29, %s398_s29 }
   0xe   :  { %p405_p6 = por %p404_p5, %p403_p4 }
  0x10   :  { %p406_p7 = pnand %p405_p6, %p399_p3 }
  0x12   :  { %409 = shalt.err (!%p406_p7)
}
  0x13   :  { %s530_s30 = smov 64   ;;  %s531_s6 = smov 4  }
  0x14   :  { %37 = dma.hbm_to_vmem [thread:$0]  %s652_s1, 1024, %s32_s19, [#allocation6], %s530_s30, %s530_s30, %s531_s6  }
  0x15   :  { %s410_s11 = scalar_lea.hbm %s654_s3, 64 }
  0x16   :  { %p411_p8 = scmp.ne.s32.totalorder %s654_s3, %s410_s11  ;;  %p414_p9 = scmp.lt.u32.totalorder %s410_s11, %s654_s3 }
  0x18   :  { %p416_p10 = pnand %p414_p9, %p411_p8 }
  0x1a   :  { %419 = shalt.err (!%p416_p10)
}
  0x1b   :  { %s420_s16 = scalar_lea.vmem %s55_s21, 64  ;;  %p425_p12 = scmp.lt.s32.totalorder %s55_s21, %s55_s21 }
  0x1c   :  { %p421_p11 = scmp.ne.s32.totalorder %s55_s21, %s420_s16  ;;  %p426_p13 = scmp.lt.s32.totalorder %s420_s16, %s420_s16 }
  0x1e   :  { %p427_p0 = por %p426_p13, %p425_p12 }
  0x20   :  { %p428_p1 = pnand %p427_p0, %p421_p11 }
  0x22   :  { %431 = shalt.err (!%p428_p1)
}
  0x23   :  { %57 = dma.hbm_to_vmem [thread:$0]  %s654_s3, 64, %s55_s21, [#allocation9]  }
  0x24   :  { %s532_s18 = smov [#allocation2]   ;;  %s533_s20 = smov [#allocation7]  }
  0x25   :  { %s19_s19 = sshll.u32 %s532_s18, 4  ;;  %s44_s22 = sshll.u32 %s533_s20, 4  ;;  %s20_s19 = int_to_ptr.vmem [resolvable:$true] %s19_s19  ;;  %s45_s22 = int_to_ptr.vmem [resolvable:$true] %s44_s22 }
  0x26   :  { %s432_s25 = scalar_lea.hbm %s651_s0, 128 }
  0x27   :  { %p433_p2 = scmp.ne.s32.totalorder %s651_s0, %s432_s25  ;;  %p436_p3 = scmp.lt.u32.totalorder %s432_s25, %s651_s0 }
  0x29   :  { %p438_p4 = pnand %p436_p3, %p433_p2 }
  0x2b   :  { %441 = shalt.err (!%p438_p4)
}
  0x2c   :  { %s442_s3 = scalar_lea.vmem %s20_s19, 128  ;;  %p447_p6 = scmp.lt.s32.totalorder %s20_s19, %s20_s19 }
  0x2d   :  { %p443_p5 = scmp.ne.s32.totalorder %s20_s19, %s442_s3  ;;  %p448_p7 = scmp.lt.s32.totalorder %s442_s3, %s442_s3 }
  0x2f   :  { %p449_p8 = por %p448_p7, %p447_p6 }
  0x31   :  { %p450_p9 = pnand %p449_p8, %p443_p5 }
  0x33   :  { %453 = shalt.err (!%p450_p9)
}
  0x34   :  { %25 = dma.hbm_to_vmem [thread:$0]  %s651_s0, 128, %s20_s19, [#allocation3], %s530_s30, %s530_s30, %s531_s6  }
  0x35   :  { %s454_s10 = scalar_lea.hbm %s653_s2, 16 }
  0x36   :  { %p455_p10 = scmp.ne.s32.totalorder %s653_s2, %s454_s10  ;;  %p458_p11 = scmp.lt.u32.totalorder %s454_s10, %s653_s2 }
  0x38   :  { %p460_p12 = pnand %p458_p11, %p455_p10 }
  0x3a   :  { %463 = shalt.err (!%p460_p12)
}
  0x3b   :  { %s464_s15 = scalar_lea.vmem %s45_s22, 16  ;;  %s468_s16 = scalar_lea.vmem %s45_s22, 32 }
  0x3c   :  { %p465_p13 = scmp.ne.s32.totalorder %s45_s22, %s464_s15  ;;  %p469_p0 = scmp.lt.s32.totalorder %s45_s22, %s45_s22 }
  0x3d   :  { %p470_p1 = scmp.lt.s32.totalorder %s468_s16, %s464_s15 }
  0x3f   :  { %p471_p2 = por %p470_p1, %p469_p0 }
  0x41   :  { %p472_p3 = pnand %p471_p2, %p465_p13 }
  0x43   :  { %475 = shalt.err (!%p472_p3)
}
  0x44   :  { %47 = dma.hbm_to_vmem [thread:$0]  %s653_s2, 16, %s45_s22, [#allocation6]  }
  0x45   :  { %s534_s17 = smov [#allocation10]   ;;  %s476_s23 = scalar_lea.hbm %s655_s4, 128 }
  0x46   :  { %s63_s18 = sshll.u32 %s534_s17, 4  ;;  %p477_p4 = scmp.ne.s32.totalorder %s655_s4, %s476_s23  ;;  %s64_s18 = int_to_ptr.vmem [resolvable:$true] %s63_s18 }
  0x47   :  { %p480_p5 = scmp.lt.u32.totalorder %s476_s23, %s655_s4 }
  0x49   :  { %p482_p6 = pnand %p480_p5, %p477_p4 }
  0x4b   :  { %485 = shalt.err (!%p482_p6)
}
  0x4c   :  { %s486_s28 = scalar_lea.vmem %s64_s18, 128  ;;  %p491_p8 = scmp.lt.s32.totalorder %s64_s18, %s64_s18 }
  0x4d   :  { %p487_p7 = scmp.ne.s32.totalorder %s64_s18, %s486_s28  ;;  %p492_p9 = scmp.lt.s32.totalorder %s486_s28, %s486_s28 }
  0x4f   :  { %p493_p10 = por %p492_p9, %p491_p8 }
  0x51   :  { %p494_p11 = pnand %p493_p10, %p487_p7 }
  0x53   :  { %497 = shalt.err (!%p494_p11)
}
  0x54   :  { %69 = dma.hbm_to_vmem [thread:$0]  %s655_s4, 128, %s64_s18, [#allocation9], %s530_s30, %s530_s30, %s531_s6  }
  0x55   :  { %520 = dma.done.wait [#allocation3], 128  }
  0x56   :  { %521 = vsyncadd [#allocation3], 4294967168 }
  0x57   :  { %522 = dma.done.wait [#allocation6], 1040  }
  0x58   :  { %523 = vsyncadd [#allocation6], 4294966256 }
  0x59   :  { %524 = dma.done.wait [#allocation9], 192  }
  0x5a   :  { %525 = vsyncadd [#allocation9], 4294967104  ;;  %v535_v0 = vmov 0.0   ;;  %vm536_vm0 = vmmov 0   ;;  %v378_v1 = vld [vmem:[#allocation5] sm:$0xff]   ;;  %v379_v2 = vld [vmem:[#allocation5 + $0x8] sm:$0xff]  }
  0x5b   :  { %326 = vmatprep.subr.bf16.mxu1 %v535_v0  ;;  %342 = vmatprep.mubr.msk.bf16.mxu1 %vm536_vm0, %v535_v0  ;;  %vm235_vm1 = vcmask 1043456   ;;  %v216_v3 = vld [vmem:[#allocation8] sm:$0xf]  ;;  %v387_v5 = vld [vmem:[#allocation10] sm:$0xff]   ;;  %vm231_vm2 = vcmask 64512   ;;  %v380_v6 = vld [vmem:[#allocation5 + $0x10] sm:$0xff]  }
  0x5c   :  { %346 = vmatprep.subr.bf16.mxu0 %v535_v0  ;;  %348 = vmatprep.mubr.msk.bf16.mxu0 %vm536_vm0, %v535_v0  ;;  %v237_v4 = vsel %vm235_vm1, %v216_v3, 0  ;;  %v381_v7 = vld [vmem:[#allocation5 + $0x18] sm:$0xff]   ;;  %v382_v8 = vld [vmem:[#allocation5 + $0x20] sm:$0xff]   ;;  %v383_v9 = vld [vmem:[#allocation5 + $0x28] sm:$0xff]   ;;  %s537_s4 = smov [#allocation11]  }
  0x5d   :  { %327 = vmatpush3.bf16.xpose.msra.mxu1 %v378_v1  ;;  %347 = vmatpush3.bf16.msra.mxu0 %v237_v4  ;;  %v384_v10 = vld [vmem:[#allocation5 + $0x30] sm:$0xff]   ;;  %v385_v11 = vld [vmem:[#allocation5 + $0x38] sm:$0xff]   ;;  %v312_v18 = vld [vmem:[#allocation7] ss:$0 sm:$0xff]  ;;  %s289_s30 = sshll.u32 %s537_s4, 4  ;;  %s290_s30 = int_to_ptr.vmem [resolvable:$true] %s289_s30 }
  0x5e   :  { %328 = vmatprep.subr.bf16.mxu1 %v535_v0  ;;  %v386_v12 = vld [vmem:[#allocation2] sm:$0xff]   ;;  %s498_s6 = scalar_lea.vmem %s290_s30, 256  ;;  %p503_p13 = scmp.lt.s32.totalorder %s290_s30, %s290_s30 }
  0x5f   :  { %p499_p12 = scmp.ne.s32.totalorder %s290_s30, %s498_s6  ;;  %p504_p0 = scmp.lt.s32.totalorder %s498_s6, %s498_s6 }
  0x60   :  { %349 = vmatmul.mubr.msk.bf16.vlgmr.msra.gmra.mrb[0].mxu0 %vm231_vm2, %v387_v5 }
  0x61   :  { %p505_p1 = por %p504_p0, %p503_p13 }
  0x63   :  { %p506_p2 = pnand %p505_p1, %p499_p12 }
  0x65   :  { %329 = vmatpush3.bf16.xpose.msra.mxu1 %v379_v2 }
  0x66   :  { %330 = vmatprep.subr.bf16.mxu1 %v535_v0 }
  0x6d   :  { %331 = vmatpush3.bf16.xpose.msra.mxu1 %v380_v6 }
  0x6e   :  { %332 = vmatprep.subr.bf16.mxu1 %v535_v0 }
  0x75   :  { %333 = vmatpush3.bf16.xpose.msra.mxu1 %v381_v7 }
  0x76   :  { %334 = vmatprep.subr.bf16.mxu1 %v535_v0 }
  0x7d   :  { %335 = vmatpush3.bf16.xpose.msra.mxu1 %v382_v8 }
  0x7e   :  { %336 = vmatprep.subr.bf16.mxu1 %v535_v0 }
  0x85   :  { %337 = vmatpush3.bf16.xpose.msra.mxu1 %v383_v9 }
  0x86   :  { %338 = vmatprep.subr.bf16.mxu1 %v535_v0 }
  0x8d   :  { %339 = vmatpush3.bf16.xpose.msra.mxu1 %v384_v10 }
  0x8e   :  { %340 = vmatprep.subr.bf16.mxu1 %v535_v0 }
  0x95   :  { %341 = vmatpush3.bf16.xpose.msra.mxu1 %v385_v11 }
  0x9c   :  { %343 = vmatmul.mubr.bf16.vlgmr.msra.gmra.mrb[0].mxu1 %v386_v12 }
 0x133   :  { %v273_v13 = vpop.f32.mrb[0].mxu0 }
 0x134   :  { %v350_v14 = vpop.f32.mrb[1].mxu0 }
 0x135   :  { %v276_v15 = vpop.f32.mrb[2].mxu0 }
 0x136   :  { %v351_v16 = vpop.f32.mrb[3].mxu0 }
 0x16f   :  { %v200_v17 = vpop.f32.mrb[0].mxu1 }
 0x170   :  { %v344_v19 = vpop.f32.mrb[1].mxu1  ;;  %v355_v22 = vadd.f32 %v312_v18, %v200_v17 }
 0x171   :  { %v203_v20 = vpop.f32.mrb[2].mxu1 }
 0x172   :  { %v345_v21 = vpop.f32.mrb[3].mxu1  ;;  %v358_v23 = vadd.f32 %v355_v22, %v273_v13  ;;  %v362_v24 = vadd.f32 %v312_v18, %v203_v20 }
 0x174   :  { %282 = vst [vmem:[#allocation11] sm:$0xff] %v358_v23  ;;  %v365_v25 = vadd.f32 %v362_v24, %v276_v15 }
 0x176   :  { %283 = vst [vmem:[#allocation11 + $0x8] sm:$0xff] %v365_v25 }
 0x177   :  { %509 = shalt.err (!%p506_p2)
}
 0x178   :  { %s510_s21 = scalar_lea.hbm %s656_s5, 256 }
 0x179   :  { %p511_p3 = scmp.ne.s32.totalorder %s656_s5, %s510_s21  ;;  %p514_p4 = scmp.lt.u32.totalorder %s510_s21, %s656_s5 }
 0x17b   :  { %p516_p5 = pnand %p514_p4, %p511_p3 }
 0x17d   :  { %519 = shalt.err (!%p516_p5)
}
 0x17e   :  { %s538_s11 = smov 128   ;;  %s539_s12 = smov 8  }
 0x17f   :  { %295 = dma.vmem_to_hbm [thread:$0]  %s290_s30, 256, %s656_s5, [#allocation4], %s538_s11, %s538_s11, %s539_s12  }
 0x180   :  { %526 = dma.done.wait [#allocation4], 256  }
 0x181   :  { %527 = vsyncadd [#allocation4], 4294967040 }
 0x182   :  { %299 = vsyncpa [#allocation3], 1 }
 0x183   :  { %300 = vsyncpa [#allocation6], 1 }
 0x184   :  { %301 = vsyncpa [#allocation9], 1 }
 0x185   :  { %302 = vsyncpa [#allocation4], 1 }

</bundles_post_ra>
